<compile_context>
chip_gen: v7x
topology: tpu7x:2x2x1
jax: 0.10.0
libtpu: 0.0.40
codegen_flags: <defaults>
</compile_context>

<pallas_src>
import jax
import jax.numpy as jnp
from jax import lax
from jax.experimental import pallas as pl
from jax.experimental.pallas import tpu as pltpu


_ON_TPU = jax.default_backend() == "tpu"


# ---------------------------------------------------------------------------
# VMEM budgeting (generation-aware) and row-tile selection
# ---------------------------------------------------------------------------
def _vmem_budgets():
    """Data budget for double-buffered tiles + scoped-VMEM limit."""
    cap = 64 * 1024 * 1024                      # conservative default (v7x has 64 MiB)
    try:
        info = pltpu.get_tpu_info()
        cap = int(getattr(info, "vmem_capacity_bytes", cap))
    except Exception:
        pass                                    # keep conservative default
    data_budget = int(cap * 0.45)               # double-buffered data tiles
    vmem_limit = min(int(cap * 0.75), 100 * 1024 * 1024)
    return data_budget, vmem_limit


def _round_up8(x):
    return ((x + 7) // 8) * 8


def _pick_tv(V, E, n_streams, data_budget):
    """Largest row tile s.t. n_streams double-buffered (tv, E) f32 tiles fit the
    VMEM data budget.  Keeps sublane (8) alignment, and keeps >= 2 grid steps
    (when V >= 16) so the 'parallel' grid axis can be split across v7x's two
    TensorCores."""
    bytes_per_row = 2 * n_streams * E * 4       # x2 for double-buffering
    tv = max(8, data_budget // max(bytes_per_row, 1))
    tv = max(8, (tv // 8) * 8)
    tv = min(tv, _round_up8(V))
    if tv >= V and V >= 16:                     # give the second TC some work
        tv = _round_up8((V + 1) // 2)
    return tv


# ---------------------------------------------------------------------------
# In-kernel randomness + inverted dropout
# ---------------------------------------------------------------------------
def _i32(v):
    """Python int -> signed int32 constant with the same 32-bit pattern."""
    v &= 0xFFFFFFFF
    return jnp.int32(v - (1 << 32) if v >= (1 << 31) else v)


def _hash_uniform31(shape, seed, row_offset):
    """Non-TPU fallback PRNG (int32 uniform in [0, 2^31)).  Row / column hash
    contributions are computed as (tv,1) and (1,E) vectors and broadcast-added
    to keep the per-vreg VALU cost low."""
    tv, E = shape
    r = (lax.broadcasted_iota(jnp.int32, (tv, 1), 0) + row_offset) * _i32(0x9E3779B1)
    c = lax.broadcasted_iota(jnp.int32, (1, E), 1) * _i32(0x85EBCA77) + seed * _i32(0x27D4EB2F)
    h = r + c
    h = h ^ ((h >> 16) & _i32(0x0000FFFF))
    h = h * _i32(0x7FEB352D)
    h = h ^ ((h >> 15) & _i32(0x0001FFFF))
    h = h * _i32(0x846CA68B)
    h = h ^ ((h >> 16) & _i32(0x0000FFFF))
    return h & _i32(0x7FFFFFFF)


def _random_bits31(shape, seed_scalar, row_offset):
    """Uniform int32 in [0, 2^31) per element of `shape`."""
    if _ON_TPU:
        # Hardware PRNG: per-tile deterministic seed, bits generation comes
        # off the VALU chain entirely (keeps the kernel HBM-bound on v7x).
        pltpu.prng_seed(seed_scalar + pl.program_id(0))
        bits = pltpu.prng_random_bits(shape)
        if bits.dtype != jnp.int32:
            bits = pltpu.bitcast(bits, jnp.int32)
        return bits & jnp.int32(0x7FFFFFFF)
    return _hash_uniform31(shape, seed_scalar, row_offset)


def _apply_dropout(x, keep_prob, seed_scalar, row_offset):
    """Inverted dropout via integer-threshold compare (no int->float convert)."""
    thresh = min(int(round(keep_prob * (1 << 31))), (1 << 31) - 1)
    bits = _random_bits31(x.shape, seed_scalar, row_offset)
    keep = bits < jnp.int32(thresh)
    return jnp.where(keep, x * jnp.float32(1.0 / keep_prob), jnp.float32(0.0))


# ---------------------------------------------------------------------------
# Kernels
# ---------------------------------------------------------------------------
def _make_simple_kernel(dr_rate, tv):
    keep_prob = 1.0 - float(dr_rate)

    def kernel(seed_ref, w_ref, o_ref):
        x = w_ref[...]                                   # (tv, E)
        o_ref[...] = _apply_dropout(x, keep_prob, seed_ref[0],
                                    pl.program_id(0) * tv)

    return kernel


def _make_pretrained_kernel(dr_rate, training, tv):
    use_dropout = bool(training) and float(dr_rate) > 0.0
    keep_prob = 1.0 - float(dr_rate)

    def kernel(seed_ref, base_ref, mask_ref, a_ref, b_ref, o_ref):
        base = base_ref[...]                             # (tv, E) merged pre/OOV table
        m = mask_ref[...]                                # (tv, 1) in {0., 1.}
        # Single vsel: mask==1 -> OOV row (already merged into base),
        #              mask==0 -> a*base + b (base == pretrained row there).
        # Numerically identical to (a*W+b)*(1-m) + OOV*m for m in {0,1}.
        x = jnp.where(m > 0.5, base, a_ref[...] * base + b_ref[...])
        if use_dropout:
            x = _apply_dropout(x, keep_prob, seed_ref[0], pl.program_id(0) * tv)
        o_ref[...] = x

    return kernel


# ---------------------------------------------------------------------------
# pallas_call wrappers
# ---------------------------------------------------------------------------
def _simple_forward(W, dr_rate, training, seed):
    V, E = W.shape
    if (not training) or float(dr_rate) <= 0.0:
        return W                                         # identity: skip V*E read+write
    data_budget, vmem_limit = _vmem_budgets()
    tv = _pick_tv(V, E, n_streams=2, data_budget=data_budget)   # W + out streams
    seed_arr = jnp.asarray([seed], dtype=jnp.int32)
    return pl.pallas_call(
        _make_simple_kernel(dr_rate, tv),
        out_shape=jax.ShapeDtypeStruct((V, E), W.dtype),
        grid_spec=pltpu.PrefetchScalarGridSpec(
            num_scalar_prefetch=1,
            grid=(pl.cdiv(V, tv),),
            in_specs=[pl.BlockSpec((tv, E), lambda i, s: (i, 0))],
            out_specs=pl.BlockSpec((tv, E), lambda i, s: (i, 0)),
        ),
        compiler_params=pltpu.CompilerParams(
            dimension_semantics=("parallel",),           # disjoint row tiles
            vmem_limit_bytes=vmem_limit),
    )(seed_arr, W)


def _pretrained_forward(base, mask, a, b, dr_rate, training, seed):
    V, E = base.shape
    data_budget, vmem_limit = _vmem_budgets()
    tv = _pick_tv(V, E, n_streams=2, data_budget=data_budget)   # base + out streams
    seed_arr = jnp.asarray([seed], dtype=jnp.int32)
    a2 = a.reshape(1, E)
    b2 = b.reshape(1, E)
    return pl.pallas_call(
        _make_pretrained_kernel(dr_rate, training, tv),
        out_shape=jax.ShapeDtypeStruct((V, E), base.dtype),
        grid_spec=pltpu.PrefetchScalarGridSpec(
            num_scalar_prefetch=1,
            grid=(pl.cdiv(V, tv),),
            in_specs=[
                pl.BlockSpec((tv, E), lambda i, s: (i, 0)),   # merged pre/OOV table
                pl.BlockSpec((tv, 1), lambda i, s: (i, 0)),   # mask (V, 1)
                pl.BlockSpec((1, E), lambda i, s: (0, 0)),    # a
                pl.BlockSpec((1, E), lambda i, s: (0, 0)),    # b
            ],
            out_specs=pl.BlockSpec((tv, E), lambda i, s: (i, 0)),
        ),
        compiler_params=pltpu.CompilerParams(
            dimension_semantics=("parallel",),
            vmem_limit_bytes=vmem_limit),
    )(seed_arr, base, mask, a2, b2)


# ---------------------------------------------------------------------------
# Module-equivalent wrapper (deterministic synthetic parameter init)
# ---------------------------------------------------------------------------
class WordEmbeddingPallas:
    # TODO(synk): Load_pretrain_emb / load_w2v read a w2v text file; replaced here
    # with a synthetic pretrained table + hit/miss mask (same shapes & semantics).
    def __init__(self, lang_size, vocab_sizes, emb_size, dr_rate, use_pretrained, key):
        self.dr_rate = float(dr_rate)
        self.emb_size = emb_size
        self.use_pretrained_emb = use_pretrained

        self.emb_list = []
        for lang in range(lang_size):
            k = jax.random.fold_in(key, lang)
            w = jax.random.normal(k, (vocab_sizes[lang], emb_size), jnp.float32)
            w = w.at[0].set(0.0)          # padding_idx = vocab2id[0]['<PAD>'] == 0
            self.emb_list.append(w)

        if use_pretrained:
            assert lang_size == 2
            tgt = 1
            V = vocab_sizes[tgt]
            # mask: 1.0 -> word NOT found in w2v (use OOV emb), 0.0 -> pretrained hit
            mask = (jnp.arange(V) % 3 == 0).astype(jnp.float32).reshape(V, 1)
            pre = jax.random.normal(jax.random.fold_in(key, 100), (V, emb_size), jnp.float32)
            pre = pre * (1.0 - mask)      # OOV rows of the pretrained table are zero
            self.emb_list[tgt] = pre
            self.mask_vec_list = mask
            oov = jax.random.normal(jax.random.fold_in(key, 200), (V, emb_size), jnp.float32)
            oov = oov.at[0].set(0.0)      # padding_idx = 0
            self.OOV_emb = oov
            self.a = jnp.ones((emb_size,), jnp.float32)    # nn.Parameter(torch.ones)
            self.b = jnp.zeros((emb_size,), jnp.float32)   # nn.Parameter(torch.zeros)
            # One-time merge (valid: pre has zero rows wherever mask == 1), so the
            # per-forward kernel streams a single table: base == pre where mask==0,
            # OOV where mask==1.  Cuts pretrained-branch HBM traffic from 3x to 2x V*E*4.
            self._base = pre + oov * mask

    def forward(self, lang, training=True, seed=0):
        # Fold lang into the seed so both embedding tables don't share a drop
        # pattern when called with the same seed within one training step.
        eff_seed = (int(seed) * 1000003 + (lang + 1) * 7919) & 0x7FFFFFFF
        if self.use_pretrained_emb and lang == 1:
            return _pretrained_forward(self._base, self.mask_vec_list,
                                       self.a, self.b, self.dr_rate,
                                       training, eff_seed)
        return _simple_forward(self.emb_list[lang], self.dr_rate, training, eff_seed)


# ---------------------------------------------------------------------------
if __name__ == "__main__":
    key = jax.random.PRNGKey(0)

    lang_size = 2
    vocab_sizes = [64, 64]    # V_size[lang] + len(shared_V), small & tile-aligned
    emb_size = 128
    dr_rate = 0.5

    mod = WordEmbeddingPallas(lang_size, vocab_sizes, emb_size, dr_rate,
                              use_pretrained=True, key=key)

    # --- eval-mode pretrained branch (kernel: affine + select, no dropout) ---
    out1 = jax.block_until_ready(mod.forward(1, training=False))
    m = mod.mask_vec_list
    ref1 = (mod.a * mod.emb_list[1] + mod.b) * (1.0 - m) + mod.OOV_emb * m
    assert jnp.allclose(out1, ref1, atol=1e-6), "lang=1 pretrained branch mismatch"

    # --- eval-mode simple branch short-circuits to the embedding table -------
    out0 = jax.block_until_ready(mod.forward(0, training=False))
    assert jnp.allclose(out0, mod.emb_list[0], atol=1e-6), "lang=0 branch mismatch"

    # --- training mode: exercise in-kernel inverted dropout in both kernels --
    keep = 1.0 - dr_rate

    out1_t = jax.block_until_ready(mod.forward(1, training=True, seed=7))
    kept1 = out1_t != 0.0
    assert jnp.allclose(jnp.where(kept1, out1_t, 0.0),
                        jnp.where(kept1, ref1 / keep, 0.0), atol=1e-5), \
        "pretrained-branch dropout values mismatch"
    nz = ref1 != 0.0
    frac = float(jnp.sum(kept1 & nz) / jnp.maximum(jnp.sum(nz), 1))
    assert 0.3 < frac < 0.7, f"dropout keep fraction off: {frac}"

    out0_t = jax.block_until_ready(mod.forward(0, training=True, seed=11))
    kept0 = out0_t != 0.0
    assert jnp.allclose(jnp.where(kept0, out0_t, 0.0),
                        jnp.where(kept0, mod.emb_list[0] / keep, 0.0), atol=1e-5), \
        "simple-branch dropout values mismatch"

    print("KERNEL_OK")
</pallas_src>

<mosaic_0001>
module attributes {stable_mosaic.version = 11 : i64} {
  func.func @kernel(%arg0: i32, %arg1: memref<1xi32, #tpu.memory_space<smem>>, %arg2: memref<32x128xf32, #tpu.memory_space<vmem>>, %arg3: memref<32x1xf32, #tpu.memory_space<vmem>>, %arg4: memref<1x128xf32, #tpu.memory_space<vmem>>, %arg5: memref<1x128xf32, #tpu.memory_space<vmem>>, %arg6: memref<32x128xf32, #tpu.memory_space<vmem>>) attributes {dimension_semantics = [#tpu.dimension_semantics<parallel>], iteration_bounds = array<i64: 2>, scalar_prefetch = 1 : i64, scratch_operands = 0 : i64, tpu.core_type = #tpu.core_type<tc>, window_params = [{transform_indices = @transform_0, window_bounds = array<i64: 32, 128>}, {transform_indices = @transform_1, window_bounds = array<i64: 32, 1>}, {pipeline_mode = #tpu.pipeline_mode<synchronous>, transform_indices = @transform_2, window_bounds = array<i64: 1, 128>}, {pipeline_mode = #tpu.pipeline_mode<synchronous>, transform_indices = @transform_3, window_bounds = array<i64: 1, 128>}, {transform_indices = @transform_4, window_bounds = array<i64: 32, 128>}]} {
    %c0 = arith.constant 0 : index
    %c0_0 = arith.constant 0 : index
    %0 = vector.load %arg2[%c0, %c0_0] : memref<32x128xf32, #tpu.memory_space<vmem>>, vector<32x128xf32>
    %c0_1 = arith.constant 0 : index
    %c0_2 = arith.constant 0 : index
    %1 = vector.load %arg3[%c0_1, %c0_2] : memref<32x1xf32, #tpu.memory_space<vmem>>, vector<32x1xf32>
    %cst = arith.constant 5.000000e-01 : f32
    %2 = vector.broadcast %cst : f32 to vector<32x1xf32>
    %3 = arith.cmpf ogt, %1, %2 : vector<32x1xf32>
    %c0_3 = arith.constant 0 : index
    %c0_4 = arith.constant 0 : index
    %4 = vector.load %arg4[%c0_3, %c0_4] : memref<1x128xf32, #tpu.memory_space<vmem>>, vector<1x128xf32>
    %5 = vector.broadcast %4 : vector<1x128xf32> to vector<32x128xf32>
    %6 = arith.mulf %5, %0 : vector<32x128xf32>
    %c0_5 = arith.constant 0 : index
    %c0_6 = arith.constant 0 : index
    %7 = vector.load %arg5[%c0_5, %c0_6] : memref<1x128xf32, #tpu.memory_space<vmem>>, vector<1x128xf32>
    %8 = vector.broadcast %7 : vector<1x128xf32> to vector<32x128xf32>
    %9 = arith.addf %6, %8 : vector<32x128xf32>
    %10 = vector.shape_cast %3 : vector<32x1xi1> to vector<32x1xi1>
    %11 = vector.broadcast %10 : vector<32x1xi1> to vector<32x128xi1>
    %12 = arith.select %11, %0, %9 : vector<32x128xi1>, vector<32x128xf32>
    %c0_7 = arith.constant 0 : index
    %c0_8 = arith.constant 0 : index
    %13 = vector.load %arg6[%c0_7, %c0_8] : memref<32x128xf32, #tpu.memory_space<vmem>>, vector<32x128xf32>
    tpu.vector_store %arg6[%c0_7, %c0_8], %12 {strides = array<i32>} : memref<32x128xf32, #tpu.memory_space<vmem>>, vector<32x128xf32>,
    return
  }
  func.func @transform_0(%arg0: i32, %arg1: memref<1xi32, #tpu.memory_space<smem>>) -> (i32, i32) {
    %c0_i32 = arith.constant 0 : i32
    %c0_i32_0 = arith.constant 0 : i32
    return %arg0, %c0_i32 : i32, i32
  }
  func.func @transform_1(%arg0: i32, %arg1: memref<1xi32, #tpu.memory_space<smem>>) -> (i32, i32) {
    %c0_i32 = arith.constant 0 : i32
    %c0_i32_0 = arith.constant 0 : i32
    return %arg0, %c0_i32 : i32, i32
  }
  func.func @transform_2(%arg0: i32, %arg1: memref<1xi32, #tpu.memory_space<smem>>) -> (i32, i32) {
    %c0_i32 = arith.constant 0 : i32
    %c0_i32_0 = arith.constant 0 : i32
    %c0_i32_1 = arith.constant 0 : i32
    return %c0_i32, %c0_i32_0 : i32, i32
  }
  func.func @transform_3(%arg0: i32, %arg1: memref<1xi32, #tpu.memory_space<smem>>) -> (i32, i32) {
    %c0_i32 = arith.constant 0 : i32
    %c0_i32_0 = arith.constant 0 : i32
    %c0_i32_1 = arith.constant 0 : i32
    return %c0_i32, %c0_i32_0 : i32, i32
  }
  func.func @transform_4(%arg0: i32, %arg1: memref<1xi32, #tpu.memory_space<smem>>) -> (i32, i32) {
    %c0_i32 = arith.constant 0 : i32
    %c0_i32_0 = arith.constant 0 : i32
    return %arg0, %c0_i32 : i32, i32
  }
}

</mosaic_0001>

<bundles_post_ra>
// kernel: tpu_custom_call.1
= control target key start
LH: loop header
LB: loop body
LE: loop exit
PB: predicated region body
PF: predicated region fallthrough
CT: control target
= control target key end

     0   :  { %11 = vsyncpa [#allocation5], 0  ;;  %s647_s0 = inlined_call_operand.<no memory space> [shape: s32[1], index: 0, kind: input, shape index: {}]   ;;  %s648_s1 = inlined_call_operand.vmem [shape: f32[64,128], index: 1, kind: input, shape index: {}]   ;;  %s649_s2 = inlined_call_operand.vmem [shape: f32[64,1], index: 2, kind: input, shape index: {}]   ;;  %s650_s3 = inlined_call_operand.vmem [shape: f32[1,128], index: 3, kind: input, shape index: {}]   ;;  %s651_s4 = inlined_call_operand.vmem [shape: f32[1,128], index: 4, kind: input, shape index: {}]   ;;  %s652_s5 = inlined_call_operand.hbm [shape: f32[64,128], index: 5, kind: output, shape index: {}]  }
   0x1   :  { %13 = vsyncpa [#allocation5 + $0x1], 0  ;;  %s532_s18 = smov 0   ;;  %s534_s0 = smov 0  }
   0x2   :  { %s536_s19 = smov 0   ;;  %s538_s20 = smov 0  }
   0x3 LB: > { %s553_s21 = sadd.s32 4294967295, %s496_s20   ;;  %s373_s22 = sadd.s32 4294967294, %s496_s20   ;;  %s496_s20 = sphi %s538_s20, %s658_s20   ;;  %s492_s19 = sphi %s536_s19, %s657_s19   ;;  %s488_s0 = sphi %s534_s0, %s656_s0   ;;  %s484_s18 = sphi %s532_s18, %s655_s18  }
   0x4   : > { %s557_s23 = sadd.s32 1, %s496_s20   ;;  %s120_s24 = sadd.s32 1, %s492_s19 }
   0x5   : > { %s117_s25 = ssub.s32 %s496_s20, %s557_s23  ;;  %p130_p0 = scmp.ne.s32.totalorder %s492_s19, %s488_s0 }
   0x6   : > { %p118_p1 = scmp.eq.s32.totalorder %s117_s25, 0  ;;  %p131_p2 = scmp.eq.s32.totalorder %s553_s21, 1 }
   0x7   : > { %p136_p3 = scmp.ne.s32.totalorder %s488_s0, %s484_s18  ;;  %p137_p4 = scmp.eq.s32.totalorder %s373_s22, 1 }
   0x8   : > { %s568_s26 = scalar_select %p118_p1, %s492_s19, %s120_s24  }
   0x9   : > { %p570_p5 = por %p131_p2, %p130_p0  ;;  %p574_p6 = por %p137_p4, %p136_p3 }
   0xa   : > { %p376_p7 = scmp.ge.s32.totalorder %s496_s20, 1  ;;  %p179_p8 = scmp.lt.s32.totalorder %s496_s20, 3 }
   0xc   : > { %p180_p9 = pnand %p376_p7, %p179_p8 }
   0xd   : > { %s378_s29 = sshll.u32 (!%p180_p9), %s553_s21, 2  ;;  %v498_v0 = vmov (!%p180_p9), 0   ;;  %v382_v9 = vld [vmem:[%s650_s3] ss:$0 sm:$0xff] (!%p180_p9)  ;;  %s207_s14 = sand.u32 (!%p180_p9), 1, %s488_s0  }
   0xe   : > { %183 = sbr.rel (%p180_p9) target bundleno = 176 (0xb0), region = 36  ;;  %433 = vset.pattern.permute.xlu1 (!%p180_p9), %v498_v0  ;;  %432 = vset.pattern.permute.xlu0 (!%p180_p9), %v498_v0  ;;  %p211_p10 = scmp.lt.s32.totalorder (!%p180_p9), %s378_s29, 7  ;;  %v383_v14 = vld [vmem:[%s651_s4] ss:$0 sm:$0xff] (!%p180_p9) }
   0xf   : > { %s377_s17 = sshll.u32 (!%p180_p9), %s207_s14, 5  ;;  %s389_s25 = sshll.u32 (!%p180_p9), %s553_s21, 9 }
  0x10   : > { %s209_s22 = scalar_lea.vmem (!%p180_p9), [#allocation4], %s377_s17  ;;  %s602_s6 = scalar_lea.hbm (!%p180_p9), %s652_s5, %s389_s25 }
  0x11   : > { %s299_s24 = sshll.u32 (!%p180_p9), %s209_s22, 4  ;;  %s606_s21 = scalar_lea.sflag (!%p180_p9), [#allocation5], %s207_s14  ;;  %s597_s24 = int_to_ptr.vmem [resolvable:$true] %s299_s24 }
  0x12   : > { %s434_s7 = scalar_lea.vmem (!%p180_p9), %s597_s24, 512 }
  0x13   : > { %p435_p11 = scmp.ne.s32.totalorder (!%p180_p9), %s597_s24, %s434_s7 }
  0x15   : > { %s660_s29 = smov (!%p211_p10, %s378_s29), 7  ;;  %p436_p12 = pnand %p435_p11, %p570_p5 }
  0x16   : > { %s379_s30 = sshll.u32 %s660_s29, 3 }
  0x17   : > { %s220_s8 = scalar_lea.vmem %s649_s2, %s379_s30  ;;  %s214_s11 = scalar_lea.vmem %s648_s1, %s379_s30 }
  0x18   : > { %v229_v1 = vld [vmem:[%s220_s8 + $0x10] sm:$0xff]  ;;  %v227_v2 = vld [vmem:[%s220_s8] sm:$0xff]  ;;  %v230_v3 = vld [vmem:[%s220_s8 + $0x18] sm:$0xff]  ;;  %p437_p13 = pneg %p436_p12 }
  0x19   : > { %vm233_vm0 = vcmp.gt.f32.partialorder %v229_v1, 0.5  ;;  %vm231_vm1 = vcmp.gt.f32.partialorder %v227_v2, 0.5  ;;  %vm234_vm2 = vcmp.gt.f32.partialorder %v230_v3, 0.5  ;;  %v228_v4 = vld [vmem:[%s220_s8 + $0x8] sm:$0xff]  ;;  %v225_v10 = vld [vmem:[%s214_s11 + $0x10] sm:$0xff]  ;;  %v223_v11 = vld [vmem:[%s214_s11] sm:$0xff] }
  0x1a   : > { %v259_v5 = vsel %vm233_vm0, 1, %v498_v0  ;;  %v257_v6 = vsel %vm231_vm1, 1, %v498_v0  ;;  %vm232_vm3 = vcmp.gt.f32.partialorder %v228_v4, 0.5  ;;  %v260_v7 = vsel %vm234_vm2, 1, %v498_v0  ;;  %v226_v15 = vld [vmem:[%s214_s11 + $0x18] sm:$0xff]  ;;  %v224_v16 = vld [vmem:[%s214_s11 + $0x8] sm:$0xff] }
  0x1b   : > { %268 = vperm.xlu1 %433, %v259_v5   ;;  %262 = vperm.xlu0 %432, %v257_v6   ;;  %v258_v8 = vsel %vm232_vm3, 1, %v498_v0  ;;  %v244_v12 = vmul.f32 %v382_v9, %v225_v10  ;;  %v242_v13 = vmul.f32 %v382_v9, %v223_v11  ;;  %v245_v19 = vmul.f32 %v382_v9, %v226_v15  ;;  %s499_s8 = smov [#allocation4]  }
  0x1c   : > { %v243_v20 = vmul.f32 %v382_v9, %v224_v16  ;;  %s438_s9 = sshll.u32 %s499_s8, 4  ;;  %s439_s9 = int_to_ptr.vmem [resolvable:$false] %s438_s9 }
  0x1d   : > { %v255_v17 = vadd.f32 %v383_v14, %v244_v12  ;;  %v253_v18 = vadd.f32 %v383_v14, %v242_v13  ;;  %v256_v25 = vadd.f32 %v383_v14, %v245_v19  ;;  %s440_s10 = scalar_lea.vmem %s439_s9, 1024  ;;  %p441_p0 = scmp.lt.s32.totalorder %s597_s24, %s439_s9 }
  0x1e   : > { %v254_v26 = vadd.f32 %v383_v14, %v243_v20  ;;  %p442_p1 = scmp.lt.s32.totalorder %s440_s10, %s434_s7 }
  0x1f   : > { %271 = vperm.xlu1 %433, %v260_v7   ;;  %265 = vperm.xlu0 %432, %v258_v8  }
  0x20   : > { %p443_p2 = por %p442_p1, %p441_p0 }
  0x22   : > { %p444_p3 = pnand %p443_p2, %p437_p13 }
  0x9a   : > { %v269_v21 = vpop.permute.xlu1 %268  ;;  %v263_v22 = vpop.permute.xlu0 %262 }
  0x9b   : > { %vm275_vm4 = vcmp.eq.s32.totalorder %v269_v21, 1  ;;  %vm273_vm5 = vcmp.eq.s32.totalorder %v263_v22, 1 }
  0x9c   : > { %v279_v23 = vsel %vm275_vm4, %v225_v10, %v255_v17  ;;  %v277_v24 = vsel %vm273_vm5, %v223_v11, %v253_v18 }
  0x9d   : > { %283 = vst [vmem:[%s209_s22 + $0x10] sm:$0xff] %v279_v23  ;;  %281 = vst [vmem:[%s209_s22] sm:$0xff] %v277_v24 }
  0x9e   : > { %v272_v27 = vpop.permute.xlu1 %271  ;;  %v266_v28 = vpop.permute.xlu0 %265 }
  0x9f   : > { %vm276_vm6 = vcmp.eq.s32.totalorder %v272_v27, 1  ;;  %vm274_vm7 = vcmp.eq.s32.totalorder %v266_v28, 1 }
  0xa0   : > { %v280_v29 = vsel %vm276_vm6, %v226_v15, %v256_v25  ;;  %v278_v30 = vsel %vm274_vm7, %v224_v16, %v254_v26 }
  0xa1   : > { %284 = vst [vmem:[%s209_s22 + $0x18] sm:$0xff] %v280_v29  ;;  %282 = vst [vmem:[%s209_s22 + $0x8] sm:$0xff] %v278_v30 }
  0xa2   : > { %447 = shalt.err (!%p444_p3)
}
  0xa3   : > { %s448_s11 = scalar_lea.hbm %s602_s6, 512  ;;  %s452_s14 = scalar_lea.hbm %s652_s5, 1024 }
  0xa4   : > { %p449_p4 = scmp.ne.s32.totalorder %s602_s6, %s448_s11  ;;  %p453_p9 = scmp.lt.u32.totalorder %s602_s6, %s652_s5 }
  0xa5   : > { %p454_p10 = scmp.lt.u32.totalorder %s452_s14, %s448_s11  ;;  %p456_p12 = scmp.lt.u32.totalorder %s448_s11, %s602_s6 }
  0xa6   : > { %p450_p7 = pnand %p449_p4, %p570_p5 }
  0xa7   : > { %p455_p11 = por %p454_p10, %p453_p9 }
  0xa8   : > { %p451_p8 = pneg %p450_p7 }
  0xa9   : > { %p457_p13 = por %p456_p12, %p455_p11 }
  0xab   : > { %p458_p0 = pnand %p457_p13, %p451_p8 }
  0xad   : > { %461 = shalt.err (!%p458_p0)
}
  0xae   : > { %s500_s17 = smov 128   ;;  %s501_s22 = smov 8  }
  0xaf   : > { %390 = dma.vmem_to_hbm [thread:$0]  (%p570_p5), %s597_s24, 512, %s602_s6, %s606_s21, %s500_s17, %s500_s17, %s501_s22  }
  0xb0 PF: > { %p396_p1 = scmp.ge.s32.totalorder %s496_s20, 2  ;;  %s314_s25 = sand.u32 1, %s484_s18  }
  0xb1   : > { %s315_s29 = scalar_lea.sflag [#allocation5], %s314_s25 }
  0xb2   : > { %p393_p2 = pnand %p396_p1, %p574_p6 }
  0xb4   : > { %479 = dma.done.wait (!%p393_p2), %s315_s29, 512  }
  0xb5   : > { %481 = vsyncadd (!%p393_p2), %s315_s29, 4294966784  ;;  %p16_p3 = scmp.ge.s32.totalorder %s557_s23, 4   ;;  %s655_s18 = smov %s488_s0 }
  0xb6   : > { %s656_s0 = smov %s492_s19  ;;  %s657_s19 = smov %s568_s26 }
  0xb7   : > { %s658_s20 = smov %s557_s23  ;;  %18 = sbr.rel (!%p16_p3) target bundleno = 3 (0x3), region = 74 }
  0xbe   :  { %320 = vsyncpa [#allocation5], 1 }
  0xbf   :  { %322 = vsyncpa [#allocation5 + $0x1], 1 }

</bundles_post_ra>
